<compile_context>
chip_gen: v7x
topology: tpu7x:2x2x1
jax: 0.10.0
libtpu: 0.0.40
codegen_flags: <defaults>
</compile_context>

<pallas_src>
import jax
import jax.numpy as jnp
from jax.experimental import pallas as pl
from jax.experimental.pallas import tpu as pltpu


def _round_up(x, m):
    return ((x + m - 1) // m) * m


def _mlp_kernel(x_ref, w1_ref, b1_ref, w2_ref, b2_ref, w3_ref, b3_ref, o_ref):
    # Layer 1: Linear (BN folded) -> ReLU.  Dropout = identity (eval mode).
    # x is cast to bf16 on the VMEM tile (weights already bf16); f32 MXU accum.
    x = x_ref[...].astype(jnp.bfloat16)
    h1 = jnp.dot(x, w1_ref[...], preferred_element_type=jnp.float32)
    h1 = jnp.maximum(h1 + b1_ref[...], 0.0)

    # Layer 2: Linear (BN folded) -> ReLU.  Dropout = identity (eval mode).
    h2 = jnp.dot(h1.astype(jnp.bfloat16), w2_ref[...],
                 preferred_element_type=jnp.float32)
    h2 = jnp.maximum(h2 + b2_ref[...], 0.0)

    # Layer 3: Linear -> Softmax over the (narrow, unpadded) class dim, in f32.
    logits = jnp.dot(h2.astype(jnp.bfloat16), w3_ref[...],
                     preferred_element_type=jnp.float32)
    logits = logits + b3_ref[...]
    m = jnp.max(logits, axis=-1, keepdims=True)
    e = jnp.exp(logits - m)
    denom = jnp.sum(e, axis=-1, keepdims=True)
    o_ref[...] = (e / denom).astype(o_ref.dtype)   # exact normalization


def malware_model_forward(x, packed_params, num_classes):
    """x: (B, input_size) f32.  Returns (B, num_classes) f32 softmax probs."""
    w1, b1, w2, b2, w3, b3 = packed_params
    B, K = x.shape
    H1 = w1.shape[1]
    H2 = w2.shape[1]
    C = w3.shape[1]
    assert C == num_classes

    # Batch tile: multiple of 8, at most 512 rows.  For B >= 16 cap TB so the
    # grid has >= 2 steps (lets "parallel" shard across both v7x TensorCores).
    B8 = _round_up(B, 8)
    TB = min(512, B8)
    if B8 >= 16:
        TB = min(TB, _round_up(pl.cdiv(B8, 2), 8))
    if TB > B:          # only when B < 8: use a full-dim batch block
        TB = B
    grid = (pl.cdiv(B, TB),)

    flops = 2 * B * (K * H1 + H1 * H2 + H2 * C)
    bytes_accessed = (
        x.size * x.dtype.itemsize
        + sum(a.size * a.dtype.itemsize for a in packed_params)
        + B * C * 4
    )

    out = pl.pallas_call(
        _mlp_kernel,
        out_shape=jax.ShapeDtypeStruct((B, C), jnp.float32),
        grid=grid,
        in_specs=[
            # x streamed per batch tile, un-padded (full-dim last axis), f32.
            pl.BlockSpec((TB, K), lambda i: (i, 0)),
            # Weights / biases: constant index_map -> stay resident in VMEM.
            pl.BlockSpec((K, H1), lambda i: (0, 0)),
            pl.BlockSpec((1, H1), lambda i: (0, 0)),
            pl.BlockSpec((H1, H2), lambda i: (0, 0)),
            pl.BlockSpec((1, H2), lambda i: (0, 0)),
            pl.BlockSpec((H2, C), lambda i: (0, 0)),
            pl.BlockSpec((1, C), lambda i: (0, 0)),
        ],
        # Narrow, full-dim class axis: masked stores, ~64x less writeback.
        out_specs=pl.BlockSpec((TB, C), lambda i: (i, 0)),
        compiler_params=pltpu.CompilerParams(
            dimension_semantics=("parallel",),   # batch tiles shard across TCs
        ),
        cost_estimate=pl.CostEstimate(
            flops=flops,
            transcendentals=B * C,
            bytes_accessed=bytes_accessed,
        ),
    )(x, w1, b1, w2, b2, w3, b3)
    return out


def init_raw_params(key, input_size, num_classes=2):
    """PyTorch-like raw parameters for MalwareModel (eval-mode BN stats)."""
    def linear(k, fan_in, fan_out):
        kw, kb = jax.random.split(k)
        bound = 1.0 / (fan_in ** 0.5)
        w = jax.random.uniform(kw, (fan_in, fan_out), jnp.float32, -bound, bound)
        b = jax.random.uniform(kb, (fan_out,), jnp.float32, -bound, bound)
        return w, b

    k1, k2, k3, k4, k5 = jax.random.split(key, 5)
    w1, b1 = linear(k1, input_size, 64)
    w2, b2 = linear(k2, 64, 32)
    w3, b3 = linear(k3, 32, num_classes)

    def bn(k, n):  # gamma, beta, running_mean, running_var (non-trivial stats)
        kg, kb_, km, kv = jax.random.split(k, 4)
        gamma = 1.0 + 0.1 * jax.random.normal(kg, (n,), jnp.float32)
        beta = 0.1 * jax.random.normal(kb_, (n,), jnp.float32)
        mean = 0.1 * jax.random.normal(km, (n,), jnp.float32)
        var = jnp.abs(1.0 + 0.1 * jax.random.normal(kv, (n,), jnp.float32))
        return gamma, beta, mean, var

    g1, be1, m1, v1 = bn(k4, 64)
    g2, be2, m2, v2 = bn(k5, 32)
    return (w1, b1, g1, be1, m1, v1, w2, b2, g2, be2, m2, v2, w3, b3)


def prepare_params(raw, eps=1e-5):
    """Fold eval-mode BatchNorm into the Linear layers; weights -> bf16."""
    (w1, b1, g1, be1, m1, v1, w2, b2, g2, be2, m2, v2, w3, b3) = raw
    s1 = g1 / jnp.sqrt(v1 + eps)
    t1 = be1 - m1 * s1
    s2 = g2 / jnp.sqrt(v2 + eps)
    t2 = be2 - m2 * s2

    w1p = (w1 * s1[None, :]).astype(jnp.bfloat16)
    b1p = (b1 * s1 + t1).reshape(1, -1)            # f32
    w2p = (w2 * s2[None, :]).astype(jnp.bfloat16)
    b2p = (b2 * s2 + t2).reshape(1, -1)            # f32
    w3p = w3.astype(jnp.bfloat16)
    b3p = b3.reshape(1, -1)                        # f32
    return (w1p, b1p, w2p, b2p, w3p, b3p)


def reference_forward(x, raw, num_classes, eps=1e-5):
    """Pure-JAX reference emulating the kernel's bf16 matmul operands."""
    (w1, b1, g1, be1, m1, v1, w2, b2, g2, be2, m2, v2, w3, b3) = raw
    s1 = g1 / jnp.sqrt(v1 + eps)
    t1 = be1 - m1 * s1
    s2 = g2 / jnp.sqrt(v2 + eps)
    t2 = be2 - m2 * s2

    w1f = (w1 * s1[None, :]).astype(jnp.bfloat16)
    b1f = b1 * s1 + t1
    w2f = (w2 * s2[None, :]).astype(jnp.bfloat16)
    b2f = b2 * s2 + t2
    w3f = w3.astype(jnp.bfloat16)

    def bdot(a, b):
        return jnp.dot(a.astype(jnp.bfloat16), b,
                       preferred_element_type=jnp.float32)

    h1 = jnp.maximum(bdot(x, w1f) + b1f, 0.0)
    h2 = jnp.maximum(bdot(h1, w2f) + b2f, 0.0)
    logits = bdot(h2, w3f) + b3
    return jax.nn.softmax(logits, axis=-1)


if __name__ == "__main__":
    batch = 8
    input_size = 32
    num_classes = 2

    key = jax.random.PRNGKey(0)
    kx, kp = jax.random.split(key)
    x = jax.random.normal(kx, (batch, input_size), jnp.float32)

    raw = init_raw_params(kp, input_size, num_classes)
    params = prepare_params(raw)

    out = malware_model_forward(x, params, num_classes)
    out = jax.block_until_ready(out)

    assert out.shape == (batch, num_classes)
    # Exact normalization -> rows sum to 1 up to f32 rounding.
    assert jnp.allclose(jnp.sum(out, axis=1), 1.0, atol=1e-4)
    # Match the pure-JAX reference (bf16-operand emulation).
    ref = reference_forward(x, raw, num_classes)
    assert jnp.allclose(out, ref, atol=5e-3, rtol=5e-3)
    print("KERNEL_OK")
</pallas_src>

<mosaic_0001>
module attributes {stable_mosaic.version = 11 : i64} {
  func.func @_mlp_kernel(%arg0: i32, %arg1: memref<8x32xf32, #tpu.memory_space<vmem>>, %arg2: memref<32x64xbf16, #tpu.memory_space<vmem>>, %arg3: memref<1x64xf32, #tpu.memory_space<vmem>>, %arg4: memref<64x32xbf16, #tpu.memory_space<vmem>>, %arg5: memref<1x32xf32, #tpu.memory_space<vmem>>, %arg6: memref<32x2xbf16, #tpu.memory_space<vmem>>, %arg7: memref<1x2xf32, #tpu.memory_space<vmem>>, %arg8: memref<8x2xf32, #tpu.memory_space<vmem>>) attributes {dimension_semantics = [#tpu.dimension_semantics<parallel>], iteration_bounds = array<i64: 1>, scalar_prefetch = 0 : i64, scratch_operands = 0 : i64, tpu.core_type = #tpu.core_type<tc>, window_params = [{transform_indices = @transform_0, window_bounds = array<i64: 8, 32>}, {pipeline_mode = #tpu.pipeline_mode<synchronous>, transform_indices = @transform_1, window_bounds = array<i64: 32, 64>}, {pipeline_mode = #tpu.pipeline_mode<synchronous>, transform_indices = @transform_2, window_bounds = array<i64: 1, 64>}, {pipeline_mode = #tpu.pipeline_mode<synchronous>, transform_indices = @transform_3, window_bounds = array<i64: 64, 32>}, {pipeline_mode = #tpu.pipeline_mode<synchronous>, transform_indices = @transform_4, window_bounds = array<i64: 1, 32>}, {pipeline_mode = #tpu.pipeline_mode<synchronous>, transform_indices = @transform_5, window_bounds = array<i64: 32, 2>}, {pipeline_mode = #tpu.pipeline_mode<synchronous>, transform_indices = @transform_6, window_bounds = array<i64: 1, 2>}, {transform_indices = @transform_7, window_bounds = array<i64: 8, 2>}]} {
    %c0 = arith.constant 0 : index
    %c0_0 = arith.constant 0 : index
    %0 = vector.load %arg1[%c0, %c0_0] : memref<8x32xf32, #tpu.memory_space<vmem>>, vector<8x32xf32>
    %1 = arith.truncf %0 : vector<8x32xf32> to vector<8x32xbf16>
    %c0_1 = arith.constant 0 : index
    %c0_2 = arith.constant 0 : index
    %2 = vector.load %arg2[%c0_1, %c0_2] : memref<32x64xbf16, #tpu.memory_space<vmem>>, vector<32x64xbf16>
    %cst = arith.constant dense<0.000000e+00> : vector<8x64xf32>
    %3 = tpu.matmul %1, %2, %cst {dimension_numbers = #tpu.dot_dimension_numbers<[1], [0], [0], [1], [0, 0, 1, 1], [], []>} : vector<8x32xbf16>, vector<32x64xbf16>, vector<8x64xf32> -> vector<8x64xf32>
    %c0_3 = arith.constant 0 : index
    %c0_4 = arith.constant 0 : index
    %4 = vector.load %arg3[%c0_3, %c0_4] : memref<1x64xf32, #tpu.memory_space<vmem>>, vector<1x64xf32>
    %5 = vector.broadcast %4 : vector<1x64xf32> to vector<8x64xf32>
    %6 = arith.addf %3, %5 : vector<8x64xf32>
    %cst_5 = arith.constant 0.000000e+00 : f32
    %7 = vector.broadcast %cst_5 : f32 to vector<8x64xf32>
    %8 = arith.maximumf %6, %7 : vector<8x64xf32>
    %9 = arith.truncf %8 : vector<8x64xf32> to vector<8x64xbf16>
    %c0_6 = arith.constant 0 : index
    %c0_7 = arith.constant 0 : index
    %10 = vector.load %arg4[%c0_6, %c0_7] : memref<64x32xbf16, #tpu.memory_space<vmem>>, vector<64x32xbf16>
    %cst_8 = arith.constant dense<0.000000e+00> : vector<8x32xf32>
    %11 = tpu.matmul %9, %10, %cst_8 {dimension_numbers = #tpu.dot_dimension_numbers<[1], [0], [0], [1], [0, 0, 1, 1], [], []>} : vector<8x64xbf16>, vector<64x32xbf16>, vector<8x32xf32> -> vector<8x32xf32>
    %c0_9 = arith.constant 0 : index
    %c0_10 = arith.constant 0 : index
    %12 = vector.load %arg5[%c0_9, %c0_10] : memref<1x32xf32, #tpu.memory_space<vmem>>, vector<1x32xf32>
    %13 = vector.broadcast %12 : vector<1x32xf32> to vector<8x32xf32>
    %14 = arith.addf %11, %13 : vector<8x32xf32>
    %cst_11 = arith.constant 0.000000e+00 : f32
    %15 = vector.broadcast %cst_11 : f32 to vector<8x32xf32>
    %16 = arith.maximumf %14, %15 : vector<8x32xf32>
    %17 = arith.truncf %16 : vector<8x32xf32> to vector<8x32xbf16>
    %c0_12 = arith.constant 0 : index
    %c0_13 = arith.constant 0 : index
    %18 = vector.load %arg6[%c0_12, %c0_13] : memref<32x2xbf16, #tpu.memory_space<vmem>>, vector<32x2xbf16>
    %cst_14 = arith.constant dense<0.000000e+00> : vector<8x2xf32>
    %19 = tpu.matmul %17, %18, %cst_14 {dimension_numbers = #tpu.dot_dimension_numbers<[1], [0], [0], [1], [0, 0, 1, 1], [], []>} : vector<8x32xbf16>, vector<32x2xbf16>, vector<8x2xf32> -> vector<8x2xf32>
    %c0_15 = arith.constant 0 : index
    %c0_16 = arith.constant 0 : index
    %20 = vector.load %arg7[%c0_15, %c0_16] : memref<1x2xf32, #tpu.memory_space<vmem>>, vector<1x2xf32>
    %21 = vector.broadcast %20 : vector<1x2xf32> to vector<8x2xf32>
    %22 = arith.addf %19, %21 : vector<8x2xf32>
    %cst_17 = arith.constant dense<0xFF800000> : vector<8xf32>
    %23 = vector.multi_reduction <maximumf>, %22, %cst_17 [1] : vector<8x2xf32> to vector<8xf32>
    %24 = vector.shape_cast %23 : vector<8xf32> to vector<8x1xf32>
    %25 = vector.broadcast %24 : vector<8x1xf32> to vector<8x2xf32>
    %26 = arith.subf %22, %25 : vector<8x2xf32>
    %27 = math.exp %26 : vector<8x2xf32>
    %cst_18 = arith.constant dense<0.000000e+00> : vector<8xf32>
    %28 = vector.multi_reduction <add>, %27, %cst_18 [1] : vector<8x2xf32> to vector<8xf32>
    %29 = vector.shape_cast %28 : vector<8xf32> to vector<8x1xf32>
    %30 = vector.broadcast %29 : vector<8x1xf32> to vector<8x2xf32>
    %31 = arith.divf %27, %30 : vector<8x2xf32>
    %c0_19 = arith.constant 0 : index
    %c0_20 = arith.constant 0 : index
    %32 = vector.load %arg8[%c0_19, %c0_20] : memref<8x2xf32, #tpu.memory_space<vmem>>, vector<8x2xf32>
    tpu.vector_store %arg8[%c0_19, %c0_20], %31 {strides = array<i32>} : memref<8x2xf32, #tpu.memory_space<vmem>>, vector<8x2xf32>,
    return
  }
  func.func @transform_0(%arg0: i32) -> (i32, i32) {
    %c0_i32 = arith.constant 0 : i32
    %c0_i32_0 = arith.constant 0 : i32
    return %arg0, %c0_i32 : i32, i32
  }
  func.func @transform_1(%arg0: i32) -> (i32, i32) {
    %c0_i32 = arith.constant 0 : i32
    %c0_i32_0 = arith.constant 0 : i32
    %c0_i32_1 = arith.constant 0 : i32
    return %c0_i32, %c0_i32_0 : i32, i32
  }
  func.func @transform_2(%arg0: i32) -> (i32, i32) {
    %c0_i32 = arith.constant 0 : i32
    %c0_i32_0 = arith.constant 0 : i32
    %c0_i32_1 = arith.constant 0 : i32
    return %c0_i32, %c0_i32_0 : i32, i32
  }
  func.func @transform_3(%arg0: i32) -> (i32, i32) {
    %c0_i32 = arith.constant 0 : i32
    %c0_i32_0 = arith.constant 0 : i32
    %c0_i32_1 = arith.constant 0 : i32
    return %c0_i32, %c0_i32_0 : i32, i32
  }
  func.func @transform_4(%arg0: i32) -> (i32, i32) {
    %c0_i32 = arith.constant 0 : i32
    %c0_i32_0 = arith.constant 0 : i32
    %c0_i32_1 = arith.constant 0 : i32
    return %c0_i32, %c0_i32_0 : i32, i32
  }
  func.func @transform_5(%arg0: i32) -> (i32, i32) {
    %c0_i32 = arith.constant 0 : i32
    %c0_i32_0 = arith.constant 0 : i32
    %c0_i32_1 = arith.constant 0 : i32
    return %c0_i32, %c0_i32_0 : i32, i32
  }
  func.func @transform_6(%arg0: i32) -> (i32, i32) {
    %c0_i32 = arith.constant 0 : i32
    %c0_i32_0 = arith.constant 0 : i32
    %c0_i32_1 = arith.constant 0 : i32
    return %c0_i32, %c0_i32_0 : i32, i32
  }
  func.func @transform_7(%arg0: i32) -> (i32, i32) {
    %c0_i32 = arith.constant 0 : i32
    %c0_i32_0 = arith.constant 0 : i32
    return %arg0, %c0_i32 : i32, i32
  }
}

</mosaic_0001>

<bundles_post_ra>
// kernel: tpu_custom_call.1
= control target key start
LH: loop header
LB: loop body
LE: loop exit
PB: predicated region body
PF: predicated region fallthrough
CT: control target
= control target key end

     0   :  { %v333_v0 = vmov 0.0   ;;  %vm334_vm0 = vmmov 0   ;;  %vm52_vm1 = vcmask 261120   ;;  %vm137_vm2 = vcmask 523264   ;;  %s422_s1 = inlined_call_operand.vmem [shape: bf16[32,64], index: 1, kind: input, shape index: {}]   ;;  %s423_s0 = inlined_call_operand.vmem [shape: f32[8,32], index: 0, kind: input, shape index: {}]   ;;  %s424_s3 = inlined_call_operand.vmem [shape: bf16[64,32], index: 3, kind: input, shape index: {}]   ;;  %s425_s5 = inlined_call_operand.vmem [shape: bf16[32,2], index: 5, kind: input, shape index: {}]   ;;  %s426_s2 = inlined_call_operand.vmem [shape: f32[1,64], index: 2, kind: input, shape index: {}]   ;;  %s427_s4 = inlined_call_operand.vmem [shape: f32[1,32], index: 4, kind: input, shape index: {}]   ;;  %s428_s6 = inlined_call_operand.vmem [shape: f32[1,2], index: 6, kind: input, shape index: {}]   ;;  %s429_s7 = inlined_call_operand.vmem [shape: f32[8,2], index: 7, kind: output, shape index: {}]  }
   0x1   :  { %291 = vmatprep.subr.bf16.mxu0 %v333_v0  ;;  %v321_v1 = vld [vmem:[%s422_s1] sm:$0xff]   ;;  %295 = vmatprep.mubr.msk.bf16.mxu0 %vm334_vm0, %v333_v0  ;;  %v322_v2 = vld [vmem:[%s422_s1 + $0x8] sm:$0xff]   ;;  %v325_v7 = vld [vmem:[%s424_s3 + $0x10] sm:$0xff]   ;;  %vm249_vm3 = vcmask 15360  }
   0x2   :  { %299 = vmatprep.subr.bf16.mxu1 %v333_v0  ;;  %307 = vmatprep.mubr.msk.bf16.mxu1 %vm334_vm0, %v333_v0  ;;  %v27_v3 = vld [vmem:[%s423_s0] sm:$0xff]  ;;  %v324_v5 = vld [vmem:[%s424_s3 + $0x8] sm:$0xff]   ;;  %v326_v8 = vld [vmem:[%s424_s3 + $0x18] sm:$0xff]  }
   0x3   :  { %292 = vmatpush3.bf16.msra.mxu0 %v321_v1  ;;  %v323_v4 = vld [vmem:[%s424_s3] sm:$0xff]   ;;  %v28_v6 = vpack.c.bf16 %v27_v3, %v27_v3  ;;  %v328_v18 = vld [vmem:[%s425_s5 + $0x8] sm:$0xff]  }
   0x4   :  { %293 = vmatprep.subr.bf16.mxu0 %v333_v0  ;;  %300 = vmatpush3.bf16.msra.mxu1 %v323_v4  ;;  %v327_v9 = vld [vmem:[%s425_s5] sm:$0xff]  }
   0x5   :  { %301 = vmatprep.subr.bf16.mxu1 %v333_v0  ;;  %v266_v10 = vld [vmem:[%s426_s2] ss:$0 sm:$0xff] }
   0x6   :  { %v270_v19 = vld [vmem:[%s427_s4] ss:$0 sm:$0xff] }
   0x7   :  { %294 = vmatpush3.bf16.msra.mxu0 %v322_v2  ;;  %v276_v27 = vld [vmem:[%s428_s6] ss:$0 sm:$0xff] }
   0x8   :  { %311 = vmatprep.subr.bf16.mxu0 %v333_v0  ;;  %302 = vmatpush3.bf16.msra.mxu1 %v324_v5 }
   0x9   :  { %303 = vmatprep.subr.bf16.mxu1 %v333_v0 }
   0xa   :  { %296 = vmatmul.mubr.msk.bf16.vlgmr.msra.gmra.mrb[0].mxu0 %vm52_vm1, %v28_v6 }
   0xb   :  { %315 = vmatprep.mubr.msk.bf16.mxu0 %vm334_vm0, %v333_v0  ;;  %312 = vmatpush3.bf16.msra.mxu0 %v327_v9 }
   0xc   :  { %304 = vmatpush3.bf16.msra.mxu1 %v325_v7  ;;  %313 = vmatprep.subr.bf16.mxu0 %v333_v0 }
   0xd   :  { %305 = vmatprep.subr.bf16.mxu1 %v333_v0 }
   0xf   :  { %314 = vmatpush3.bf16.msra.mxu0 %v328_v18 }
  0x10   :  { %306 = vmatpush3.bf16.msra.mxu1 %v326_v8 }
  0xdd   :  { %v90_v11 = vpop.f32.mrb[0].mxu0 }
  0xde   :  { %v91_v12 = vadd.f32 %v266_v10, %v90_v11  ;;  %v297_v13 = vpop.f32.mrb[1].mxu0 }
  0xdf   :  { %v93_v14 = vpop.f32.mrb[2].mxu0 }
  0xe0   :  { %v96_v15 = vmax.f32 %v91_v12, 0.0  ;;  %v298_v16 = vpop.f32.mrb[3].mxu0 }
  0xe2   :  { %v97_v17 = vpack.c.bf16 %v96_v15, %v96_v15 }
  0xe4   :  { %308 = vmatmul.mubr.msk.bf16.vlgmr.msra.gmra.mrb[0].mxu1 %vm137_vm2, %v97_v17 }
 0x1b7   :  { %v175_v20 = vpop.f32.mrb[0].mxu1 }
 0x1b8   :  { %v176_v21 = vadd.f32 %v270_v19, %v175_v20  ;;  %v309_v22 = vpop.f32.mrb[1].mxu1 }
 0x1b9   :  { %v178_v23 = vpop.f32.mrb[2].mxu1 }
 0x1ba   :  { %v181_v24 = vmax.f32 %v176_v21, 0.0  ;;  %v310_v25 = vpop.f32.mrb[3].mxu1 }
 0x1bc   :  { %v182_v26 = vpack.c.bf16 %v181_v24, %v181_v24 }
 0x1be   :  { %316 = vmatmul.mubr.msk.bf16.vlgmr.msra.gmra.mrb[4].mxu0 %vm52_vm1, %v182_v26 }
 0x291   :  { %v243_v28 = vpop.f32.mrb[4].mxu0 }
 0x292   :  { %v244_v29 = vadd.f32 %v276_v27, %v243_v28  ;;  %v317_v30 = vpop.f32.mrb[5].mxu0 }
 0x293   :  { %v246_v31 = vpop.f32.mrb[6].mxu0 }
 0x294   :  { %v318_v32 = vpop.f32.mrb[7].mxu0  ;;  %v250_v33 = vsel %vm249_vm3, %v244_v29, -inf }
 0x295   :  { %251 = vmax.xlane.f32.xlu0 %v250_v33 }
 0x322   :  { %v252_v34 = vpop.xlane.xlu0 %251 }
 0x323   :  { %v253_v35 = vsub.f32 %v244_v29, %v252_v34 }
 0x325   :  { %v254_v36 = vmul.f32 1.442695, %v253_v35 }
 0x327   :  { %329 = vpow2.f32 %v254_v36 }
 0x331   :  { %v330_v37 = vpop.eup %329 }
 0x332   :  { %v256_v38 = vsel %vm249_vm3, %v330_v37, 0.0 }
 0x333   :  { %257 = vadd.xlane.f32.xlu0 %v256_v38 }
 0x3c0   :  { %v258_v39 = vpop.xlane.xlu0 %257 }
 0x3c1   :  { %331 = vrcp.f32 %v258_v39 }
 0x3cb   :  { %v332_v40 = vpop.eup %331 }
 0x3cc   :  { %v260_v41 = vmul.f32 %v332_v40, %v330_v37 }
 0x3ce   :  { %261 = vst.msk [vmem:[%s429_s7] sm:$0xff] %vm249_vm3, %v260_v41 }

</bundles_post_ra>
